<compile_context>
chip_gen: v7x
topology: tpu7x:2x2x1
jax: 0.10.0
libtpu: 0.0.40
codegen_flags: <defaults>
</compile_context>

<pallas_src>
import math
from functools import partial

import numpy as np
import jax
import jax.numpy as jnp
from jax.experimental import pallas as pl
from jax.experimental.pallas import tpu as pltpu

D = 256            # input feature dim
H = 128            # LSTM hidden dim = 16 * 8
K = 16             # goal embedding dim
A = 8              # number of actions
C = 4              # horizon (goals list has C+1 entries)
NGATE = 4 * H      # 512 gate pre-activations

# ---- module-level constants: built once ----
_rep_np = np.zeros((K, H), np.float32)
_rep_np[np.arange(H) % K, np.arange(H)] = 1.0        # replicates a (.,16) vector 8x along lanes
_seg_np = np.zeros((H, H), np.float32)
_seg_np[np.arange(H), np.arange(H) // K] = 1.0       # segment-sum of 16-lane groups into lanes 0..7
REP = jnp.asarray(_rep_np)                           # (16, 128)  (folded into W_phi at pack time)
SEGPAD = jnp.asarray(_seg_np)                        # (128, 128) (VMEM-resident in the kernel)


def _make_worker_kernel(tc, t_total):
    """Kernel factory: `tc` inner steps per grid step; `t_total` real steps (for tail masking)."""
    needs_mask = (t_total % tc) != 0

    def kernel(preact_ref, wrep_ref, hx_ref, cx_ref, whh_ref, seg_ref,
               out_ref, h_ref, c_ref):
        t_chunk = pl.program_id(1)

        # h/c live in the resident (constant index_map over t) output blocks; seed at t==0.
        @pl.when(t_chunk == 0)
        def _():
            h_ref[...] = hx_ref[...]
            c_ref[...] = cx_ref[...]

        # loop-invariant loads, hoisted out of the unrolled inner loop
        whh = whh_ref[...]                                         # (H, 4H) bf16
        seg = seg_ref[...]                                         # (H, H)  f32
        lane = jax.lax.broadcasted_iota(jnp.int32, (1, H), 1)
        base = t_chunk * tc

        def step(s, carry):
            h_prev, c_prev = carry
            # recurrent matmul only: (B,128) bf16 @ (128,512) bf16 -> f32, + hoisted z-projection
            acts = preact_ref[s] + jnp.dot(h_prev.astype(jnp.bfloat16), whh,
                                           preferred_element_type=jnp.float32)
            i_g = jax.nn.sigmoid(acts[:, 0 * H:1 * H])
            f_g = jax.nn.sigmoid(acts[:, 1 * H:2 * H])
            g_g = jnp.tanh(acts[:, 2 * H:3 * H])
            o_g = jax.nn.sigmoid(acts[:, 3 * H:4 * H])
            c_new = f_g * c_prev + i_g * g_g
            h_new = o_g * jnp.tanh(c_new)

            # actor = softmax(bmm(h.view(B,8,16), w)) via precomputed w_rep + segment-sum.
            # This tail is off the h/c critical path; the unrolled loop lets the scheduler
            # overlap it with the next step's recurrent matmul.
            logits_pad = jnp.dot(h_new * wrep_ref[s], seg,
                                 preferred_element_type=jnp.float32)   # lanes 0..7 real
            masked = jnp.where(lane < A, logits_pad, jnp.float32(-1e30))
            m = jnp.max(masked, axis=-1, keepdims=True)
            e = jnp.exp(masked - m)                                    # exactly 0 in padding lanes
            out_ref[s] = e / jnp.sum(e, axis=-1, keepdims=True)

            if needs_mask:   # padded tail steps must not advance the recurrent state
                valid = (base + s) < t_total
                return (jnp.where(valid, h_new, h_prev),
                        jnp.where(valid, c_new, c_prev))
            return (h_new, c_new)

        h_fin, c_fin = jax.lax.fori_loop(0, tc, step, (h_ref[...], c_ref[...]),
                                         unroll=True)
        h_ref[...] = h_fin
        c_ref[...] = c_fin

    return kernel


def init_params(key):
    """PyTorch-convention parameters for Worker (LSTMCell + phi + critic_head)."""
    ks = jax.random.split(key, 7)
    s_lstm = 1.0 / math.sqrt(H)
    s_lin = 1.0 / math.sqrt(D)
    u = lambda k, shape, s: jax.random.uniform(k, shape, jnp.float32, -s, s)
    return dict(
        W_ih=u(ks[0], (4 * H, D), s_lstm),
        W_hh=u(ks[1], (4 * H, H), s_lstm),
        b_ih=u(ks[2], (4 * H,), s_lstm),
        b_hh=u(ks[3], (4 * H,), s_lstm),
        W_phi=u(ks[4], (K, D), s_lin),
        W_c=u(ks[5], (1, D), s_lin),
        b_c=u(ks[6], (1,), s_lin),
    )


def prepare_worker_params(p):
    """One-time packing: transposed bf16 MXU weights, fused bias, REP folded into W_phi."""
    return dict(
        w_ih_t=p["W_ih"].T.astype(jnp.bfloat16),                   # (256, 512) for the pre-pass
        w_hh_t=p["W_hh"].T.astype(jnp.bfloat16),                   # (128, 512) resident in-kernel
        b_gates=(p["b_ih"] + p["b_hh"]).reshape(1, NGATE),         # f32, folded into the pre-pass
        wphi_rep=jnp.dot(p["W_phi"].T, REP).astype(jnp.bfloat16),  # (256, 128) goal path, hoisted
        wc_t=p["W_c"].T.astype(jnp.bfloat16),                      # (256, 1) critic, hoisted
        b_c=p["b_c"].reshape(1, 1),
    )


@partial(jax.jit, static_argnames=("tc", "bchunk"))
def worker_forward_rollout(z_seq, hidden, goals_sum_seq, packed, *, tc=16, bchunk=None):
    """Fused multi-step worker head.
    z_seq: (T,B,D); goals_sum_seq: (T,B,D) (already summed over the C+1 goals);
    hidden = (hx, cx) each (B,H).  Returns actor (T,B,A), critic (T,B,1), final (h,c).
    `tc`: LSTM steps per grid step (8-32 typical).  `bchunk`: batch rows per core
    (multiple of 8) to use the 2nd TensorCore on v7x when B >= 16."""
    hx, cx = hidden
    T, B, _ = z_seq.shape
    tc = max(1, min(tc, T))
    bb = B if bchunk is None else int(bchunk)
    if B % bb or (bb != B and bb % 8):
        raise ValueError("bchunk must divide B and be a multiple of 8")
    gb = B // bb
    gt = -(-T // tc)
    t_pad = gt * tc

    # ---- batched pre-pass: everything with no h/c dependence (MXU sees T*B rows) ----
    zf = z_seq.reshape(T * B, D).astype(jnp.bfloat16)
    preact = (jnp.dot(zf, packed["w_ih_t"], preferred_element_type=jnp.float32)
              + packed["b_gates"]).reshape(T, B, NGATE)
    wrep = jnp.dot(goals_sum_seq.reshape(T * B, D).astype(jnp.bfloat16),
                   packed["wphi_rep"],
                   preferred_element_type=jnp.float32).reshape(T, B, H)
    critic = (jnp.dot(zf, packed["wc_t"], preferred_element_type=jnp.float32)
              + packed["b_c"]).reshape(T, B, 1)
    if t_pad != T:
        preact = jnp.pad(preact, ((0, t_pad - T), (0, 0), (0, 0)))
        wrep = jnp.pad(wrep, ((0, t_pad - T), (0, 0), (0, 0)))

    step_map = lambda b, t: (t, b, 0)
    carry_map = lambda b, t: (b, 0)
    const_map = lambda b, t: (0, 0)

    flops = 2 * t_pad * B * (H * NGATE + H * H)
    transcendentals = 7 * t_pad * B * H
    bytes_accessed = (2 * H * NGATE + 4 * H * H                    # resident W_hh^T + SEGPAD
                      + 4 * t_pad * B * (NGATE + 2 * H)            # streamed preact, w_rep, out
                      + 4 * 4 * B * H)                             # hx, cx, h_out, c_out

    out, h_new, c_new = pl.pallas_call(
        _make_worker_kernel(tc, T),
        grid=(gb, gt),
        in_specs=[
            pl.BlockSpec((tc, bb, NGATE), step_map),   # preact (z-proj + biases), per time-chunk
            pl.BlockSpec((tc, bb, H), step_map),       # w_rep, per time-chunk
            pl.BlockSpec((bb, H), carry_map),          # hx (read once at t == 0)
            pl.BlockSpec((bb, H), carry_map),          # cx
            pl.BlockSpec((H, NGATE), const_map),       # W_hh^T (bf16, VMEM-resident)
            pl.BlockSpec((H, H), const_map),           # SEGPAD (VMEM-resident)
        ],
        out_specs=(
            pl.BlockSpec((tc, bb, H), step_map),       # softmax(actor) in lanes 0..7
            pl.BlockSpec((bb, H), carry_map),          # final h (carried across t)
            pl.BlockSpec((bb, H), carry_map),          # final c
        ),
        out_shape=(
            jax.ShapeDtypeStruct((t_pad, B, H), jnp.float32),
            jax.ShapeDtypeStruct((B, H), jnp.float32),
            jax.ShapeDtypeStruct((B, H), jnp.float32),
        ),
        compiler_params=pltpu.CompilerParams(
            dimension_semantics=("parallel", "arbitrary")),
        cost_estimate=pl.CostEstimate(flops=flops, transcendentals=transcendentals,
                                      bytes_accessed=bytes_accessed),
    )(preact, wrep, hx, cx, packed["w_hh_t"], SEGPAD)

    actor = out[:T, :, :A]
    return actor, critic, (h_new, c_new)


def worker_forward(z, hidden, goals, packed):
    """Single-step equivalent of the PyTorch Worker.forward (z, hidden, list of goals)."""
    g_sum = jnp.stack(goals).sum(axis=0)
    actor, critic, hidden_out = worker_forward_rollout(
        z[None], hidden, g_sum[None], packed, tc=1)
    return actor[0], critic[0], hidden_out


def reference_step(z, hidden, goals, p):
    """Pure-JAX reference of the PyTorch semantics; matmul operands rounded to bf16
    to mirror the kernel's weight storage (accumulation stays f32)."""
    r16 = lambda x: x.astype(jnp.bfloat16).astype(jnp.float32)
    hx, cx = hidden
    gates = (r16(z) @ r16(p["W_ih"].T) + r16(hx) @ r16(p["W_hh"].T)
             + p["b_ih"] + p["b_hh"])
    i, f, g, o = jnp.split(gates, 4, axis=-1)
    i, f, g, o = jax.nn.sigmoid(i), jax.nn.sigmoid(f), jnp.tanh(g), jax.nn.sigmoid(o)
    c_new = f * cx + i * g
    h_new = o * jnp.tanh(c_new)
    u = h_new.reshape(h_new.shape[0], A, K)
    g_sum = jnp.stack(goals).sum(axis=0)
    w = r16(g_sum) @ r16(p["W_phi"].T)
    logits = jnp.einsum("bak,bk->ba", u, w)
    actor = jax.nn.softmax(logits, axis=-1)
    critic = r16(z) @ r16(p["W_c"].T) + p["b_c"]
    return actor, critic, (h_new, c_new)


# TODO(synk): Worker.intrinsic_reward (cosine-similarity loop over the horizon) is not part of
# forward() and is left to plain JAX.

if __name__ == "__main__":
    B = 8          # sublane-aligned batch (multiple of 8)
    T = 6          # rollout length; with tc=4 this exercises chunking AND tail masking
    key = jax.random.PRNGKey(0)
    kp, kz, kh, kc, kg = jax.random.split(key, 5)
    params = init_params(kp)
    packed = prepare_worker_params(params)        # one-time weight packing

    z_seq = jax.random.normal(kz, (T, B, D), jnp.float32)
    hx = jax.random.normal(kh, (B, H), jnp.float32)
    cx = jax.random.normal(kc, (B, H), jnp.float32)
    goals_seq = jax.random.normal(kg, (T, C + 1, B, D), jnp.float32)

    # ---- single-step call: exact equivalent of Worker.forward ----
    goals0 = [goals_seq[0, i] for i in range(C + 1)]
    actor, critic, (h1, c1) = worker_forward(z_seq[0], (hx, cx), goals0, packed)
    jax.block_until_ready((actor, critic, h1, c1))

    ra, rc, (rh, rcell) = reference_step(z_seq[0], (hx, cx), goals0, params)
    assert jnp.allclose(actor, ra, atol=5e-3), "actor mismatch (single step)"
    assert jnp.allclose(critic, rc, atol=5e-3), "critic mismatch (single step)"
    assert jnp.allclose(h1, rh, atol=5e-3), "hidden mismatch (single step)"
    assert jnp.allclose(c1, rcell, atol=5e-3), "cell mismatch (single step)"

    # ---- fused T-step rollout: hoisted pre-pass + chunked time loop in one kernel ----
    g_sum_seq = goals_seq.sum(axis=1)                          # (T, B, D)
    actor_seq, critic_seq, (hT, cT) = worker_forward_rollout(
        z_seq, (hx, cx), g_sum_seq, packed, tc=4)
    jax.block_until_ready((actor_seq, critic_seq, hT, cT))

    hh, cc = hx, cx
    ref_a, ref_c = [], []
    for t in range(T):
        goals_t = [goals_seq[t, i] for i in range(C + 1)]
        a_t, c_t, (hh, cc) = reference_step(z_seq[t], (hh, cc), goals_t, params)
        ref_a.append(a_t)
        ref_c.append(c_t)
    assert jnp.allclose(actor_seq, jnp.stack(ref_a), atol=5e-3), "actor mismatch (rollout)"
    assert jnp.allclose(critic_seq, jnp.stack(ref_c), atol=5e-3), "critic mismatch (rollout)"
    assert jnp.allclose(hT, hh, atol=5e-3), "hidden mismatch (rollout)"
    assert jnp.allclose(cT, cc, atol=5e-3), "cell mismatch (rollout)"

    print("KERNEL_OK")
</pallas_src>

<mosaic_0001>
module attributes {stable_mosaic.version = 11 : i64} {
  func.func @kernel(%arg0: i32, %arg1: i32, %arg2: memref<1x8x512xf32, #tpu.memory_space<vmem>>, %arg3: memref<1x8x128xf32, #tpu.memory_space<vmem>>, %arg4: memref<8x128xf32, #tpu.memory_space<vmem>>, %arg5: memref<8x128xf32, #tpu.memory_space<vmem>>, %arg6: memref<128x512xbf16, #tpu.memory_space<vmem>>, %arg7: memref<128x128xf32, #tpu.memory_space<vmem>>, %arg8: memref<1x8x128xf32, #tpu.memory_space<vmem>>, %arg9: memref<8x128xf32, #tpu.memory_space<vmem>>, %arg10: memref<8x128xf32, #tpu.memory_space<vmem>>) attributes {dimension_semantics = [#tpu.dimension_semantics<parallel>, #tpu.dimension_semantics<arbitrary>], iteration_bounds = array<i64: 1, 1>, scalar_prefetch = 0 : i64, scratch_operands = 0 : i64, tpu.core_type = #tpu.core_type<tc>, window_params = [{transform_indices = @transform_0, window_bounds = array<i64: 1, 8, 512>}, {transform_indices = @transform_1, window_bounds = array<i64: 1, 8, 128>}, {transform_indices = @transform_2, window_bounds = array<i64: 8, 128>}, {transform_indices = @transform_3, window_bounds = array<i64: 8, 128>}, {pipeline_mode = #tpu.pipeline_mode<synchronous>, transform_indices = @transform_4, window_bounds = array<i64: 128, 512>}, {pipeline_mode = #tpu.pipeline_mode<synchronous>, transform_indices = @transform_5, window_bounds = array<i64: 128, 128>}, {transform_indices = @transform_6, window_bounds = array<i64: 1, 8, 128>}, {transform_indices = @transform_7, window_bounds = array<i64: 8, 128>}, {transform_indices = @transform_8, window_bounds = array<i64: 8, 128>}]} {
    %c0_i32 = arith.constant 0 : i32
    %0 = arith.cmpi eq, %arg1, %c0_i32 : i32
    %1 = arith.extui %0 : i1 to i32
    %c0_i32_0 = arith.constant 0 : i32
    %2 = arith.cmpi ne, %1, %c0_i32_0 : i32
    scf.if %2 {
      %c0_26 = arith.constant 0 : index
      %c0_27 = arith.constant 0 : index
      %65 = vector.load %arg4[%c0_26, %c0_27] : memref<8x128xf32, #tpu.memory_space<vmem>>, vector<8x128xf32>
      %c0_28 = arith.constant 0 : index
      %c0_29 = arith.constant 0 : index
      %66 = vector.load %arg9[%c0_28, %c0_29] : memref<8x128xf32, #tpu.memory_space<vmem>>, vector<8x128xf32>
      tpu.vector_store %arg9[%c0_28, %c0_29], %65 {strides = array<i32>} : memref<8x128xf32, #tpu.memory_space<vmem>>, vector<8x128xf32>,
      %c0_30 = arith.constant 0 : index
      %c0_31 = arith.constant 0 : index
      %67 = vector.load %arg5[%c0_30, %c0_31] : memref<8x128xf32, #tpu.memory_space<vmem>>, vector<8x128xf32>
      %c0_32 = arith.constant 0 : index
      %c0_33 = arith.constant 0 : index
      %68 = vector.load %arg10[%c0_32, %c0_33] : memref<8x128xf32, #tpu.memory_space<vmem>>, vector<8x128xf32>
      tpu.vector_store %arg10[%c0_32, %c0_33], %67 {strides = array<i32>} : memref<8x128xf32, #tpu.memory_space<vmem>>, vector<8x128xf32>,
    } else {
    }
    %c0 = arith.constant 0 : index
    %c0_1 = arith.constant 0 : index
    %3 = vector.load %arg6[%c0, %c0_1] : memref<128x512xbf16, #tpu.memory_space<vmem>>, vector<128x512xbf16>
    %c0_2 = arith.constant 0 : index
    %c0_3 = arith.constant 0 : index
    %4 = vector.load %arg7[%c0_2, %c0_3] : memref<128x128xf32, #tpu.memory_space<vmem>>, vector<128x128xf32>
    %5 = tpu.iota {dimensions = array<i32: 1>} : vector<1x128xi32>
    %c0_4 = arith.constant 0 : index
    %c0_5 = arith.constant 0 : index
    %6 = vector.load %arg9[%c0_4, %c0_5] : memref<8x128xf32, #tpu.memory_space<vmem>>, vector<8x128xf32>
    %c0_6 = arith.constant 0 : index
    %c0_7 = arith.constant 0 : index
    %7 = vector.load %arg10[%c0_6, %c0_7] : memref<8x128xf32, #tpu.memory_space<vmem>>, vector<8x128xf32>
    %c0_i32_8 = arith.constant 0 : i32
    %8 = arith.index_cast %c0_i32_8 : i32 to index
    %c0_9 = arith.constant 0 : index
    %c0_10 = arith.constant 0 : index
    %9 = vector.load %arg2[%8, %c0_9, %c0_10] : memref<1x8x512xf32, #tpu.memory_space<vmem>>, vector<1x8x512xf32>
    %10 = vector.shape_cast %9 : vector<1x8x512xf32> to vector<8x512xf32>
    %11 = arith.truncf %6 : vector<8x128xf32> to vector<8x128xbf16>
    %cst = arith.constant dense<0.000000e+00> : vector<8x512xf32>
    %12 = tpu.matmul %11, %3, %cst {dimension_numbers = #tpu.dot_dimension_numbers<[1], [0], [0], [1], [0, 0, 1, 1], [], []>} : vector<8x128xbf16>, vector<128x512xbf16>, vector<8x512xf32> -> vector<8x512xf32>
    %13 = arith.addf %10, %12 : vector<8x512xf32>
    %14 = vector.extract_strided_slice %13 {offsets = [0, 0], sizes = [8, 128], strides = [1, 1]} : vector<8x512xf32> to vector<8x128xf32>
    %15 = arith.negf %14 : vector<8x128xf32>
    %16 = math.exp %15 : vector<8x128xf32>
    %cst_11 = arith.constant 1.000000e+00 : f32
    %17 = vector.broadcast %cst_11 : f32 to vector<8x128xf32>
    %18 = arith.addf %17, %16 : vector<8x128xf32>
    %19 = arith.divf %17, %18 : vector<8x128xf32>
    %20 = vector.extract_strided_slice %13 {offsets = [0, 128], sizes = [8, 128], strides = [1, 1]} : vector<8x512xf32> to vector<8x128xf32>
    %21 = arith.negf %20 : vector<8x128xf32>
    %22 = math.exp %21 : vector<8x128xf32>
    %cst_12 = arith.constant 1.000000e+00 : f32
    %23 = vector.broadcast %cst_12 : f32 to vector<8x128xf32>
    %24 = arith.addf %23, %22 : vector<8x128xf32>
    %25 = arith.divf %23, %24 : vector<8x128xf32>
    %26 = vector.extract_strided_slice %13 {offsets = [0, 256], sizes = [8, 128], strides = [1, 1]} : vector<8x512xf32> to vector<8x128xf32>
    %27 = math.tanh %26 : vector<8x128xf32>
    %28 = vector.extract_strided_slice %13 {offsets = [0, 384], sizes = [8, 128], strides = [1, 1]} : vector<8x512xf32> to vector<8x128xf32>
    %29 = arith.negf %28 : vector<8x128xf32>
    %30 = math.exp %29 : vector<8x128xf32>
    %cst_13 = arith.constant 1.000000e+00 : f32
    %31 = vector.broadcast %cst_13 : f32 to vector<8x128xf32>
    %32 = arith.addf %31, %30 : vector<8x128xf32>
    %33 = arith.divf %31, %32 : vector<8x128xf32>
    %34 = arith.mulf %25, %7 : vector<8x128xf32>
    %35 = arith.mulf %19, %27 : vector<8x128xf32>
    %36 = arith.addf %34, %35 : vector<8x128xf32>
    %37 = math.tanh %36 : vector<8x128xf32>
    %38 = arith.mulf %33, %37 : vector<8x128xf32>
    %39 = arith.index_cast %c0_i32_8 : i32 to index
    %c0_14 = arith.constant 0 : index
    %c0_15 = arith.constant 0 : index
    %40 = vector.load %arg3[%39, %c0_14, %c0_15] : memref<1x8x128xf32, #tpu.memory_space<vmem>>, vector<1x8x128xf32>
    %41 = vector.shape_cast %40 : vector<1x8x128xf32> to vector<8x128xf32>
    %42 = arith.mulf %38, %41 : vector<8x128xf32>
    %cst_16 = arith.constant dense<0.000000e+00> : vector<8x128xf32>
    %43 = tpu.matmul %42, %4, %cst_16 {dimension_numbers = #tpu.dot_dimension_numbers<[1], [0], [0], [1], [0, 0, 1, 1], [], []>} : vector<8x128xf32>, vector<128x128xf32>, vector<8x128xf32> -> vector<8x128xf32>
    %c8_i32 = arith.constant 8 : i32
    %44 = vector.broadcast %c8_i32 : i32 to vector<1x128xi32>
    %45 = arith.cmpi slt, %5, %44 : vector<1x128xi32>
    %cst_17 = arith.constant -1.000000e+30 : f32
    %46 = vector.shape_cast %45 : vector<1x128xi1> to vector<1x128xi1>
    %47 = vector.broadcast %46 : vector<1x128xi1> to vector<8x128xi1>
    %48 = vector.broadcast %cst_17 : f32 to vector<8x128xf32>
    %49 = arith.select %47, %43, %48 : vector<8x128xi1>, vector<8x128xf32>
    %cst_18 = arith.constant dense<0xFF800000> : vector<8xf32>
    %50 = vector.multi_reduction <maximumf>, %49, %cst_18 [1] : vector<8x128xf32> to vector<8xf32>
    %51 = vector.shape_cast %50 : vector<8xf32> to vector<8x1xf32>
    %52 = vector.broadcast %51 : vector<8x1xf32> to vector<8x128xf32>
    %53 = arith.subf %49, %52 : vector<8x128xf32>
    %54 = math.exp %53 : vector<8x128xf32>
    %cst_19 = arith.constant dense<0.000000e+00> : vector<8xf32>
    %55 = vector.multi_reduction <add>, %54, %cst_19 [1] : vector<8x128xf32> to vector<8xf32>
    %56 = vector.shape_cast %55 : vector<8xf32> to vector<8x1xf32>
    %57 = vector.broadcast %56 : vector<8x1xf32> to vector<8x128xf32>
    %58 = arith.divf %54, %57 : vector<8x128xf32>
    %59 = arith.index_cast %c0_i32_8 : i32 to index
    %c0_20 = arith.constant 0 : index
    %c0_21 = arith.constant 0 : index
    %60 = vector.load %arg8[%59, %c0_20, %c0_21] : memref<1x8x128xf32, #tpu.memory_space<vmem>>, vector<1x8x128xf32>
    %61 = vector.shape_cast %60 : vector<1x8x128xf32> to vector<8x128xf32>
    %62 = vector.shape_cast %58 : vector<8x128xf32> to vector<1x8x128xf32>
    tpu.vector_store %arg8[%59, %c0_20, %c0_21], %62 {strides = array<i32>} : memref<1x8x128xf32, #tpu.memory_space<vmem>>, vector<1x8x128xf32>,
    %c1_i32 = arith.constant 1 : i32
    %c0_22 = arith.constant 0 : index
    %c0_23 = arith.constant 0 : index
    %63 = vector.load %arg9[%c0_22, %c0_23] : memref<8x128xf32, #tpu.memory_space<vmem>>, vector<8x128xf32>
    tpu.vector_store %arg9[%c0_22, %c0_23], %38 {strides = array<i32>} : memref<8x128xf32, #tpu.memory_space<vmem>>, vector<8x128xf32>,
    %c0_24 = arith.constant 0 : index
    %c0_25 = arith.constant 0 : index
    %64 = vector.load %arg10[%c0_24, %c0_25] : memref<8x128xf32, #tpu.memory_space<vmem>>, vector<8x128xf32>
    tpu.vector_store %arg10[%c0_24, %c0_25], %36 {strides = array<i32>} : memref<8x128xf32, #tpu.memory_space<vmem>>, vector<8x128xf32>,
    return
  }
  func.func @transform_0(%arg0: i32, %arg1: i32) -> (i32, i32, i32) {
    %c0_i32 = arith.constant 0 : i32
    %c0_i32_0 = arith.constant 0 : i32
    return %arg1, %arg0, %c0_i32 : i32, i32, i32
  }
  func.func @transform_1(%arg0: i32, %arg1: i32) -> (i32, i32, i32) {
    %c0_i32 = arith.constant 0 : i32
    %c0_i32_0 = arith.constant 0 : i32
    return %arg1, %arg0, %c0_i32 : i32, i32, i32
  }
  func.func @transform_2(%arg0: i32, %arg1: i32) -> (i32, i32) {
    %c0_i32 = arith.constant 0 : i32
    %c0_i32_0 = arith.constant 0 : i32
    return %arg0, %c0_i32 : i32, i32
  }
  func.func @transform_3(%arg0: i32, %arg1: i32) -> (i32, i32) {
    %c0_i32 = arith.constant 0 : i32
    %c0_i32_0 = arith.constant 0 : i32
    return %arg0, %c0_i32 : i32, i32
  }
  func.func @transform_4(%arg0: i32, %arg1: i32) -> (i32, i32) {
    %c0_i32 = arith.constant 0 : i32
    %c0_i32_0 = arith.constant 0 : i32
    %c0_i32_1 = arith.constant 0 : i32
    return %c0_i32, %c0_i32_0 : i32, i32
  }
  func.func @transform_5(%arg0: i32, %arg1: i32) -> (i32, i32) {
    %c0_i32 = arith.constant 0 : i32
    %c0_i32_0 = arith.constant 0 : i32
    %c0_i32_1 = arith.constant 0 : i32
    return %c0_i32, %c0_i32_0 : i32, i32
  }
  func.func @transform_6(%arg0: i32, %arg1: i32) -> (i32, i32, i32) {
    %c0_i32 = arith.constant 0 : i32
    %c0_i32_0 = arith.constant 0 : i32
    return %arg1, %arg0, %c0_i32 : i32, i32, i32
  }
  func.func @transform_7(%arg0: i32, %arg1: i32) -> (i32, i32) {
    %c0_i32 = arith.constant 0 : i32
    %c0_i32_0 = arith.constant 0 : i32
    return %arg0, %c0_i32 : i32, i32
  }
  func.func @transform_8(%arg0: i32, %arg1: i32) -> (i32, i32) {
    %c0_i32 = arith.constant 0 : i32
    %c0_i32_0 = arith.constant 0 : i32
    return %arg0, %c0_i32 : i32, i32
  }
}

</mosaic_0001>

<bundles_post_ra>
// kernel: worker_forward_rollout.1
= control target key start
LH: loop header
LB: loop body
LE: loop exit
PB: predicated region body
PF: predicated region fallthrough
CT: control target
= control target key end

     0   :  { %14 = vsyncpa [#allocation3], 0  ;;  %v749_v2 = vmov 0   ;;  %s1002_s0 = inlined_call_operand.vmem [shape: f32[1,8,512], index: 0, kind: input, shape index: {}]   ;;  %s1003_s1 = inlined_call_operand.vmem [shape: f32[1,8,128], index: 1, kind: input, shape index: {}]   ;;  %s1004_s2 = inlined_call_operand.vmem [shape: f32[8,128], index: 2, kind: input, shape index: {}]   ;;  %s1005_s3 = inlined_call_operand.vmem [shape: f32[8,128], index: 3, kind: input, shape index: {}]   ;;  %s1006_s4 = inlined_call_operand.vmem [shape: bf16[128,512], index: 4, kind: input, shape index: {}]   ;;  %s1007_s5 = inlined_call_operand.vmem [shape: f32[128,128], index: 5, kind: input, shape index: {}]   ;;  %s1008_s6 = inlined_call_operand.hbm [shape: f32[1,8,128], index: 6, kind: output, shape index: {0}]   ;;  %s1009_s7 = inlined_call_operand.hbm [shape: f32[8,128], index: 7, kind: output, shape index: {1}]   ;;  %s1010_s8 = inlined_call_operand.hbm [shape: f32[8,128], index: 8, kind: output, shape index: {2}]  }
   0x1   :  { %v611_v0 = vld [vmem:[%s1006_s4 + $0x4] ss:$16 sps:$4 sm:$0xff]   ;;  %v613_v1 = vld [vmem:[%s1006_s4] ss:$16 sps:$4 sm:$0xff]   ;;  %286 = vmatprep.mubr.bf16.mxu0 %v749_v2  ;;  %327 = vmatprep.mubr.bf16.mxu1 %v749_v2  ;;  %v622_v6 = vld [vmem:[%s1006_s4 + $0xc] ss:$16 sps:$4 sm:$0xff]  }
   0x2   :  { %254 = vmatprep.subr.bf16.mxu0 %v611_v0  ;;  %v614_v3 = vld [vmem:[%s1006_s4 + $0x24] ss:$16 sps:$4 sm:$0xff]   ;;  %v616_v4 = vld [vmem:[%s1006_s4 + $0x20] ss:$16 sps:$4 sm:$0xff]   ;;  %v625_v7 = vld [vmem:[%s1006_s4 + $0x8] ss:$16 sps:$4 sm:$0xff]   ;;  %295 = vmatprep.subr.bf16.mxu1 %v622_v6 }
   0x3   :  { %255 = vmatpush1.bf16.msra.mxu0 %v613_v1  ;;  %v617_v5 = vld [vmem:[%s1006_s4 + $0x44] ss:$16 sps:$4 sm:$0xff]   ;;  %v619_v8 = vld [vmem:[%s1006_s4 + $0x40] ss:$16 sps:$4 sm:$0xff]   ;;  %296 = vmatpush1.bf16.msra.mxu1 %v625_v7  ;;  %v628_v10 = vld [vmem:[%s1006_s4 + $0x2c] ss:$16 sps:$4 sm:$0xff]  }
   0x4   :  { %256 = vmatprep.subr.bf16.mxu0 %v614_v3  ;;  %v620_v9 = vld [vmem:[%s1006_s4 + $0x64] ss:$16 sps:$4 sm:$0xff]   ;;  %v631_v11 = vld [vmem:[%s1006_s4 + $0x28] ss:$16 sps:$4 sm:$0xff]   ;;  %297 = vmatprep.subr.bf16.mxu1 %v628_v10  ;;  %v624_v12 = vld [vmem:[%s1006_s4 + $0x60] ss:$16 sps:$4 sm:$0xff]  }
   0x5   :  { %v626_v13 = vld [vmem:[%s1006_s4 + $0x84] ss:$16 sps:$4 sm:$0xff]   ;;  %v634_v14 = vld [vmem:[%s1006_s4 + $0x4c] ss:$16 sps:$4 sm:$0xff]   ;;  %v637_v15 = vld [vmem:[%s1006_s4 + $0x48] ss:$16 sps:$4 sm:$0xff]  }
   0x6   :  { %v640_v16 = vld [vmem:[%s1006_s4 + $0x6c] ss:$16 sps:$4 sm:$0xff]   ;;  %v630_v17 = vld [vmem:[%s1006_s4 + $0x80] ss:$16 sps:$4 sm:$0xff]   ;;  %v632_v18 = vld [vmem:[%s1006_s4 + $0xa4] ss:$16 sps:$4 sm:$0xff]  }
   0x7   :  { %257 = vmatpush1.bf16.msra.mxu0 %v616_v4  ;;  %298 = vmatpush1.bf16.msra.mxu1 %v631_v11  ;;  %v643_v19 = vld [vmem:[%s1006_s4 + $0x68] ss:$16 sps:$4 sm:$0xff]   ;;  %v646_v20 = vld [vmem:[%s1006_s4 + $0x8c] ss:$16 sps:$4 sm:$0xff]   ;;  %v636_v21 = vld [vmem:[%s1006_s4 + $0xa0] ss:$16 sps:$4 sm:$0xff]  }
   0x8   :  { %258 = vmatprep.subr.bf16.mxu0 %v617_v5  ;;  %299 = vmatprep.subr.bf16.mxu1 %v634_v14  ;;  %v638_v22 = vld [vmem:[%s1006_s4 + $0xc4] ss:$16 sps:$4 sm:$0xff]   ;;  %v649_v23 = vld [vmem:[%s1006_s4 + $0x88] ss:$16 sps:$4 sm:$0xff]   ;;  %v650_v24 = vld [vmem:[%s1006_s4 + $0xac] ss:$16 sps:$4 sm:$0xff]  }
   0xb   :  { %259 = vmatpush1.bf16.msra.mxu0 %v619_v8  ;;  %300 = vmatpush1.bf16.msra.mxu1 %v637_v15 }
   0xc   :  { %260 = vmatprep.subr.bf16.mxu0 %v620_v9  ;;  %301 = vmatprep.subr.bf16.mxu1 %v640_v16 }
   0xf   :  { %261 = vmatpush1.bf16.msra.mxu0 %v624_v12  ;;  %302 = vmatpush1.bf16.msra.mxu1 %v643_v19 }
  0x10   :  { %262 = vmatprep.subr.bf16.mxu0 %v626_v13  ;;  %303 = vmatprep.subr.bf16.mxu1 %v646_v20 }
  0x13   :  { %263 = vmatpush1.bf16.msra.mxu0 %v630_v17 }
  0x14   :  { %264 = vmatprep.subr.bf16.mxu0 %v632_v18 }
  0x15   :  { %15 = vsyncpa [#allocation5], 0  ;;  %v642_v25 = vld [vmem:[%s1006_s4 + $0xc0] ss:$16 sps:$4 sm:$0xff]   ;;  %v644_v26 = vld [vmem:[%s1006_s4 + $0xe4] ss:$16 sps:$4 sm:$0xff]   ;;  %304 = vmatpush1.bf16.msra.mxu1 %v649_v23 }
  0x16   :  { %v652_v27 = vld [vmem:[%s1006_s4 + $0xa8] ss:$16 sps:$4 sm:$0xff]   ;;  %305 = vmatprep.subr.bf16.mxu1 %v650_v24  ;;  %v653_v28 = vld [vmem:[%s1006_s4 + $0xcc] ss:$16 sps:$4 sm:$0xff]   ;;  %v648_v29 = vld [vmem:[%s1006_s4 + $0xe0] ss:$16 sps:$4 sm:$0xff]  }
  0x17   :  { %265 = vmatpush1.bf16.msra.mxu0 %v636_v21  ;;  %v33_v30 = vld [vmem:[%s1004_s2] sm:$0xff]  ;;  %v655_v31 = vld [vmem:[%s1006_s4 + $0xc8] ss:$16 sps:$4 sm:$0xff]   ;;  %v656_v32 = vld [vmem:[%s1006_s4 + $0xec] ss:$16 sps:$4 sm:$0xff]   ;;  %v750_v37 = vmov 0.0|0.0  }
  0x18   :  { %266 = vmatprep.subr.bf16.mxu0 %v638_v22  ;;  %v93_v33 = vpack.c.bf16 %v33_v30, %v33_v30  ;;  %v658_v34 = vld [vmem:[%s1006_s4 + $0xe8] ss:$16 sps:$4 sm:$0xff]   ;;  %v69_v35 = vld [vmem:[%s1007_s5] sm:$0xff]  ;;  %v71_v39 = vld [vmem:[%s1007_s5 + $0x10] sm:$0xff]  ;;  %vm751_vm0 = vmmov 0   ;;  %v752_v54 = vmov 0.0  }
  0x19   :  { %306 = vmatpush1.bf16.msra.mxu1 %v652_v27  ;;  %v70_v36 = vld [vmem:[%s1007_s5 + $0x8] sm:$0xff]  ;;  %v72_v40 = vld [vmem:[%s1007_s5 + $0x18] sm:$0xff]  ;;  %v73_v42 = vld [vmem:[%s1007_s5 + $0x20] sm:$0xff] }
  0x1a   :  { %307 = vmatprep.subr.bf16.mxu1 %v653_v28  ;;  %v581_v38 = vpack.c.bf16 %v70_v36, %v69_v35  ;;  %v584_v41 = vpack.c.bf16 %v72_v40, %v71_v39  ;;  %v74_v43 = vld [vmem:[%s1007_s5 + $0x28] sm:$0xff]  ;;  %v75_v45 = vld [vmem:[%s1007_s5 + $0x30] sm:$0xff]  ;;  %v76_v46 = vld [vmem:[%s1007_s5 + $0x38] sm:$0xff] }
  0x1b   :  { %267 = vmatpush1.bf16.msra.mxu0 %v642_v25  ;;  %v587_v44 = vpack.c.bf16 %v74_v43, %v73_v42  ;;  %v590_v47 = vpack.c.bf16 %v76_v46, %v75_v45  ;;  %v77_v48 = vld [vmem:[%s1007_s5 + $0x40] sm:$0xff]  ;;  %v78_v49 = vld [vmem:[%s1007_s5 + $0x48] sm:$0xff]  ;;  %v79_v51 = vld [vmem:[%s1007_s5 + $0x50] sm:$0xff] }
  0x1c   :  { %268 = vmatprep.subr.bf16.mxu0 %v644_v26  ;;  %v593_v50 = vpack.c.bf16 %v78_v49, %v77_v48  ;;  %v80_v52 = vld [vmem:[%s1007_s5 + $0x58] sm:$0xff]  ;;  %v81_v55 = vld [vmem:[%s1007_s5 + $0x60] sm:$0xff]  ;;  %v82_v56 = vld [vmem:[%s1007_s5 + $0x68] sm:$0xff] }
  0x1d   :  { %308 = vmatpush1.bf16.msra.mxu1 %v655_v31  ;;  %v596_v53 = vpack.c.bf16 %v80_v52, %v79_v51  ;;  %v599_v57 = vpack.c.bf16 %v82_v56, %v81_v55  ;;  %v83_v58 = vld [vmem:[%s1007_s5 + $0x70] sm:$0xff]  ;;  %v84_v59 = vld [vmem:[%s1007_s5 + $0x78] sm:$0xff]  ;;  %v89_v61 = vld [vmem:[%s1002_s0] sm:$0xff] }
  0x1e   :  { %309 = vmatprep.subr.bf16.mxu1 %v656_v32  ;;  %v602_v60 = vpack.c.bf16 %v84_v59, %v83_v58  ;;  %v90_v62 = vld [vmem:[%s1002_s0 + $0x8] sm:$0xff]  ;;  %v92_v7 = vld [vmem:[%s1002_s0 + $0x18] sm:$0xff]  ;;  %v91_v13 = vld [vmem:[%s1002_s0 + $0x10] sm:$0xff] }
  0x1f   :  { %269 = vmatpush1.bf16.msra.mxu0 %v648_v29  ;;  %v35_v22 = vld [vmem:[%s1005_s3] sm:$0xff]  ;;  %s753_s3 = smov [#allocation4]  }
  0x20   :  { %580 = vmatprep.subr.bf16.mxu0 %v750_v37  ;;  %v364_v31 = vld [vmem:[%s1003_s1] sm:$0xff]  ;;  %s468_s21 = sshll.u32 %s753_s3, 4  ;;  %s469_s21 = int_to_ptr.vmem [resolvable:$true] %s468_s21 }
  0x21   :  { %310 = vmatpush1.bf16.msra.mxu1 %v658_v34  ;;  %v85_v34 = vlaneseq  ;;  %s679_s1 = scalar_lea.vmem %s469_s21, 128  ;;  %p684_p1 = scmp.lt.s32.totalorder %s469_s21, %s469_s21 }
  0x22   :  { %287 = vmatmul.mubr.bf16.vlgmr.msra.gmra.mrb[0].mxu0 %v93_v33  ;;  %p680_p0 = scmp.ne.s32.totalorder %s469_s21, %s679_s1  ;;  %p685_p2 = scmp.lt.s32.totalorder %s679_s1, %s679_s1 }
  0x23   :  { %582 = vmatpush3.bf16.msra.mxu0 %v581_v38  ;;  %577 = vmatprep.mubr.msk.f32.mxu0 %vm751_vm0, %v752_v54  ;;  %v86_v35 = vand.u32 127, %v85_v34 }
  0x24   :  { %328 = vmatmul.mubr.bf16.vlgmr.msra.gmra.mrb[0].mxu1 %v93_v33  ;;  %583 = vmatprep.subr.bf16.mxu0 %v750_v37  ;;  %p686_p3 = por %p685_p2, %p684_p1 }
  0x25   :  { %vm436_vm1 = vcmp.lt.s32.totalorder %v86_v35, 8 }
  0x26   :  { %p687_p4 = pnand %p686_p3, %p680_p0 }
  0x27   :  { %585 = vmatpush3.bf16.msra.mxu0 %v584_v41 }
  0x28   :  { %586 = vmatprep.subr.bf16.mxu0 %v750_v37 }
  0x2b   :  { %588 = vmatpush3.bf16.msra.mxu0 %v587_v44 }
  0x2c   :  { %589 = vmatprep.subr.bf16.mxu0 %v750_v37 }
  0x2f   :  { %591 = vmatpush3.bf16.msra.mxu0 %v590_v47 }
  0x30   :  { %592 = vmatprep.subr.bf16.mxu0 %v750_v37 }
  0x33   :  { %594 = vmatpush3.bf16.msra.mxu0 %v593_v50 }
  0x34   :  { %595 = vmatprep.subr.bf16.mxu0 %v750_v37 }
  0x37   :  { %597 = vmatpush3.bf16.msra.mxu0 %v596_v53 }
  0x38   :  { %598 = vmatprep.subr.bf16.mxu0 %v750_v37 }
  0x3b   :  { %600 = vmatpush3.bf16.msra.mxu0 %v599_v57 }
  0x3c   :  { %601 = vmatprep.subr.bf16.mxu0 %v750_v37 }
  0x3f   :  { %603 = vmatpush3.bf16.msra.mxu0 %v602_v60 }
  0xf5   :  { %v288_v63 = vpop.f32.mrb[0].mxu0 }
  0xf6   :  { %v336_v0 = vadd.f32 %v288_v63, %v89_v61  ;;  %v290_v1 = vpop.f32.mrb[1].mxu0 }
  0xf7   :  { %v337_v2 = vadd.f32 %v290_v1, %v90_v62  ;;  %v292_v3 = vpop.f32.mrb[2].mxu0  ;;  %v329_v8 = vpop.f32.mrb[0].mxu1 }
  0xf8   :  { %v525_v4 = vmul.f32 -1.442695, %v336_v0  ;;  %v293_v5 = vpop.f32.mrb[3].mxu0  ;;  %v331_v9 = vpop.f32.mrb[1].mxu1  ;;  %v338_v15 = vadd.f32 %v329_v8, %v91_v13 }
  0xf9   :  { %v526_v6 = vmul.f32 -1.442695, %v337_v2  ;;  %v339_v10 = vadd.f32 %v331_v9, %v92_v7  ;;  %v333_v11 = vpop.f32.mrb[2].mxu1 }
  0xfa   :  { %659 = vpow2.f32 %v525_v4  ;;  %v334_v12 = vpop.f32.mrb[3].mxu1 }
  0xfb   :  { %661 = vpow2.f32 %v526_v6  ;;  %v527_v14 = vmul.f32 -1.442695, %v339_v10 }
  0xfd   :  { %663 = vpow2.f32 %v527_v14 }
  0xfe   :  { %665 = vtanh.f32 %v338_v15 }
 0x104   :  { %v660_v16 = vpop.eup %659 }
 0x105   :  { %v662_v17 = vpop.eup %661  ;;  %v343_v18 = vadd.f32 1.0, %v660_v16 }
 0x106   :  { %v349_v19 = vadd.f32 1.0, %v662_v17 }
 0x107   :  { %667 = vrcp.f32 %v343_v18  ;;  %v664_v20 = vpop.eup %663 }
 0x108   :  { %669 = vrcp.f32 %v349_v19  ;;  %v666_v21 = vpop.eup %665  ;;  %v356_v24 = vadd.f32 1.0, %v664_v20 }
 0x10a   :  { %671 = vrcp.f32 %v356_v24 }
 0x111   :  { %v668_v23 = vpop.eup %667 }
 0x112   :  { %v670_v25 = vpop.eup %669  ;;  %v360_v26 = vmul.f32 %v668_v23, %v666_v21 }
 0x113   :  { %v359_v27 = vmul.f32 %v670_v25, %v35_v22 }
 0x114   :  { %v672_v29 = vpop.eup %671 }
 0x115   :  { %v361_v28 = vadd.f32 %v360_v26, %v359_v27 }
 0x117   :  { %673 = vtanh.f32 %v361_v28  ;;  %451 = vst [vmem:[#allocation6] sm:$0xff] %v361_v28 }
 0x121   :  { %v674_v30 = vpop.eup %673 }
 0x122   :  { %v363_v32 = vmul.f32 %v674_v30, %v672_v29 }
 0x124   :  { %v365_v33 = vmul.f32 %v364_v31, %v363_v32  ;;  %450 = vst [vmem:[#allocation4] sm:$0xff] %v363_v32 }
 0x126   :  { %578 = vmatmul.mubr.f32.vlgmr.msra.gmra.mrb[4].mxu0 %v365_v33 }
 0x1f9   :  { %v432_v36 = vpop.f32.mrb[4].mxu0 }
 0x1fa   :  { %v579_v37 = vpop.f32.mrb[5].mxu0  ;;  %v439_v38 = vsel %vm436_vm1, %v432_v36, -1e+30 }
 0x1fb   :  { %440 = vmax.xlane.f32.xlu0 %v439_v38 }
 0x288   :  { %v441_v39 = vpop.xlane.xlu0 %440 }
 0x289   :  { %v442_v40 = vsub.f32 %v439_v38, %v441_v39 }
 0x28b   :  { %v443_v41 = vmul.f32 1.442695, %v442_v40 }
 0x28d   :  { %675 = vpow2.f32 %v443_v41 }
 0x297   :  { %v676_v42 = vpop.eup %675 }
 0x298   :  { %445 = vadd.xlane.f32.xlu0 %v676_v42 }
 0x299   :  { %690 = shalt.err (!%p687_p4)
}
 0x29a   :  { %s691_s24 = scalar_lea.hbm %s1009_s7, 128 }
 0x29b   :  { %p692_p5 = scmp.ne.s32.totalorder %s1009_s7, %s691_s24  ;;  %p695_p6 = scmp.lt.u32.totalorder %s691_s24, %s1009_s7 }
 0x29d   :  { %p697_p7 = pnand %p695_p6, %p692_p5 }
 0x29f   :  { %700 = shalt.err (!%p697_p7)
}
 0x2a0   :  { %471 = dma.vmem_to_hbm [thread:$0]  %s469_s21, 128, %s1009_s7, [#allocation5]  }
 0x2a1   :  { %s754_s30 = smov [#allocation6]  }
 0x2a2   :  { %s478_s9 = sshll.u32 %s754_s30, 4  ;;  %s479_s9 = int_to_ptr.vmem [resolvable:$true] %s478_s9 }
 0x2a3   :  { %s701_s4 = scalar_lea.vmem %s479_s9, 128  ;;  %p706_p9 = scmp.lt.s32.totalorder %s479_s9, %s479_s9 }
 0x2a4   :  { %p702_p8 = scmp.ne.s32.totalorder %s479_s9, %s701_s4  ;;  %p707_p10 = scmp.lt.s32.totalorder %s701_s4, %s701_s4 }
 0x2a6   :  { %p708_p11 = por %p707_p10, %p706_p9 }
 0x2a8   :  { %p709_p12 = pnand %p708_p11, %p702_p8 }
 0x2aa   :  { %712 = shalt.err (!%p709_p12)
}
 0x2ab   :  { %s713_s12 = scalar_lea.hbm %s1010_s8, 128 }
 0x2ac   :  { %p714_p13 = scmp.ne.s32.totalorder %s1010_s8, %s713_s12  ;;  %p717_p0 = scmp.lt.u32.totalorder %s713_s12, %s1010_s8 }
 0x2ae   :  { %p719_p1 = pnand %p717_p0, %p714_p13 }
 0x2b0   :  { %722 = shalt.err (!%p719_p1)
}
 0x2b1   :  { %481 = dma.vmem_to_hbm [thread:$0]  %s479_s9, 128, %s1010_s8, [#allocation5]  }
 0x2b2   :  { %s755_s17 = smov [#allocation2]  }
 0x2b3   :  { %s458_s18 = sshll.u32 %s755_s17, 4  ;;  %s459_s18 = int_to_ptr.vmem [resolvable:$true] %s458_s18 }
 0x2b4   :  { %s723_s19 = scalar_lea.vmem %s459_s18, 128  ;;  %p728_p3 = scmp.lt.s32.totalorder %s459_s18, %s459_s18 }
 0x2b5   :  { %p724_p2 = scmp.ne.s32.totalorder %s459_s18, %s723_s19  ;;  %p729_p4 = scmp.lt.s32.totalorder %s723_s19, %s723_s19 }
 0x2b7   :  { %p730_p5 = por %p729_p4, %p728_p3 }
 0x2b9   :  { %p731_p6 = pnand %p730_p5, %p724_p2 }
 0x325   :  { %v446_v43 = vpop.xlane.xlu0 %445 }
 0x326   :  { %677 = vrcp.f32 %v446_v43 }
 0x330   :  { %v678_v44 = vpop.eup %677 }
 0x331   :  { %v448_v45 = vmul.f32 %v678_v44, %v676_v42 }
 0x333   :  { %449 = vst [vmem:[#allocation2] sm:$0xff] %v448_v45 }
 0x334   :  { %734 = shalt.err (!%p731_p6)
}
 0x335   :  { %s735_s3 = scalar_lea.hbm %s1008_s6, 128 }
 0x336   :  { %p736_p7 = scmp.ne.s32.totalorder %s1008_s6, %s735_s3  ;;  %p739_p8 = scmp.lt.u32.totalorder %s735_s3, %s1008_s6 }
 0x338   :  { %p741_p9 = pnand %p739_p8, %p736_p7 }
 0x33a   :  { %744 = shalt.err (!%p741_p9)
}
 0x33b   :  { %461 = dma.vmem_to_hbm [thread:$0]  %s459_s18, 128, %s1008_s6, [#allocation3]  }
 0x33c   :  { %745 = dma.done.wait [#allocation3], 128  }
 0x33d   :  { %746 = vsyncadd [#allocation3], 4294967168 }
 0x33e   :  { %747 = dma.done.wait [#allocation5], 256  }
 0x33f   :  { %748 = vsyncadd [#allocation5], 4294967040 }
 0x340   :  { %491 = vsyncpa [#allocation3], 1 }
 0x341   :  { %492 = vsyncpa [#allocation5], 1 }

</bundles_post_ra>
